<compile_context>
chip_gen: v7x
topology: tpu7x:2x2x1
jax: 0.10.0
libtpu: 0.0.40
codegen_flags: <defaults>
</compile_context>

<pallas_src>
import functools

import jax
import jax.numpy as jnp
from jax.experimental import pallas as pl
from jax.experimental.pallas import tpu as pltpu


_LANE = 128
_TILE_BYTES_TARGET = 2 * 1024 * 1024  # per x tile; with ~6 double-buffered
                                      # tiles this stays well under VMEM
                                      # limits on v5e/v6e/v7x.


def _add_embed_kernel(x_ref, e_ref, o_ref, *, scale):
    # x_ref / o_ref: (tr, tn) VMEM tiles of the flattened (R, N) view.
    # e_ref:         (1, tn)  VMEM tile of the flattened embedding; its block
    #                index only depends on the outer grid axis, so it stays
    #                resident across the inner (repeat) axis.
    o_ref[...] = x_ref[...] + e_ref[...] * scale


def _choose_tiles(num_rows, num_cols, itemsize):
    """Pick (row_tile, lane_tile) for the flattened (R, N) elementwise add."""
    # Lane (last-dim) tile: full extent unless N is 128-aligned and large.
    tn = num_cols
    if num_cols % _LANE == 0:
        max_tn = max(_LANE, (_TILE_BYTES_TARGET // itemsize) // _LANE * _LANE)
        tn = min(num_cols, max_tn)
    # Row (sublane) tile: full extent when small, otherwise a multiple of 8.
    if num_rows <= 8:
        tr = num_rows
    else:
        rows = max(1, _TILE_BYTES_TARGET // max(1, tn * itemsize))
        tr = min(num_rows, max(8, (rows // 8) * 8))
    return tr, tn


def motion_embedding_spatial_add(x, embed_slice, scale):
    """out[b, s, d] = x[b, s, d] + scale * embed_slice[b % HW, s, d]."""
    B, S, D = x.shape
    HW, S_e, D_e = embed_slice.shape
    if (S_e, D_e) != (S, D):
        raise ValueError("embedding slice must match x's (seq, dim)")
    if B % HW != 0:
        raise ValueError("batch must be a multiple of h*w (repeat semantics)")
    R = B // HW
    N = HW * S * D

    # Lane-dense flattened views: the repeat axis becomes the (small) row
    # axis; everything that shares an embedding entry becomes the lane axis.
    x_flat = x.reshape(R, N)
    e_flat = embed_slice.reshape(1, N)

    itemsize = jnp.dtype(x.dtype).itemsize
    tr, tn = _choose_tiles(R, N, itemsize)

    n_tiles = pl.cdiv(N, tn)
    r_tiles = pl.cdiv(R, tr)
    # v7x has two TensorCores; make sure a tiny problem still exposes >= 2
    # parallel grid steps so both cores get work.
    if n_tiles * r_tiles == 1 and N % (2 * _LANE) == 0:
        tn = N // 2
        n_tiles = pl.cdiv(N, tn)

    kernel = functools.partial(_add_embed_kernel, scale=float(scale))

    out_flat = pl.pallas_call(
        kernel,
        out_shape=jax.ShapeDtypeStruct((R, N), x.dtype),
        # N axis outer, repeat axis inner: the embedding block index is
        # constant across the inner axis, so Pallas DMAs it once per n-tile
        # and reuses it from VMEM for all repeats.
        grid=(n_tiles, r_tiles),
        in_specs=[
            pl.BlockSpec((tr, tn), lambda n, r: (r, n)),   # x
            pl.BlockSpec((1, tn), lambda n, r: (0, n)),    # embed (resident)
        ],
        out_specs=pl.BlockSpec((tr, tn), lambda n, r: (r, n)),
        compiler_params=pltpu.CompilerParams(
            dimension_semantics=("parallel", "parallel")),
    )(x_flat, e_flat)

    return out_flat.reshape(B, S, D)


def _linear_interp_seq(e, out_len):
    """F.interpolate(mode='linear', align_corners=False) along axis 1.

    Plain JAX glue (not a kernel); in the reference module the slice to
    seq_length happens *before* this call, so it is numerically an identity.
    """
    in_len = e.shape[1]
    if in_len == out_len:
        return e
    pos = (jnp.arange(out_len, dtype=jnp.float32) + 0.5) * (in_len / out_len) - 0.5
    pos = jnp.clip(pos, 0.0, in_len - 1)
    lo = jnp.floor(pos).astype(jnp.int32)
    hi = jnp.minimum(lo + 1, in_len - 1)
    w = (pos - lo.astype(jnp.float32))[None, :, None]
    return e[:, lo, :] * (1.0 - w) + e[:, hi, :] * w


class MotionEmbeddingSpatial:
    """JAX/Pallas port of the PyTorch MotionEmbeddingSpatial module."""

    def __init__(self, h, w, embed_dim, max_seq_length=32, key=None):
        if key is None:
            key = jax.random.PRNGKey(0)
        # Reference inits nn.Parameter(torch.zeros(...)); use a deterministic
        # random init so the add/scale path is numerically exercised.
        self.embed = jax.random.normal(
            key, (h * w, max_seq_length, embed_dim), dtype=jnp.float32)
        self.scale = 1.0
        self.trained_length = -1

    def set_scale(self, scale):
        self.scale = scale

    def set_lengths(self, trained_length):
        if trained_length > self.embed.shape[1] or trained_length <= 0:
            raise ValueError("Trained length is out of bounds")
        self.trained_length = trained_length

    def __call__(self, x):
        _, seq_length, _ = x.shape
        embeddings = self.embed[:, :seq_length]
        if self.trained_length != -1 and seq_length != self.trained_length:
            # Matches the reference exactly: it slices to seq_length first,
            # so this resample is an identity. Kept for semantic fidelity.
            embeddings = _linear_interp_seq(embeddings, seq_length)
        if embeddings.shape[1] != seq_length:
            raise ValueError("Interpolated embeddings sequence length mismatch")
        # Hot path (broadcasted add + scale with modulo repeat) runs in Pallas.
        return motion_embedding_spatial_add(x, embeddings, self.scale)


if __name__ == "__main__":
    # Small deterministic example: h=w=4 -> HW=16 spatial tokens,
    # embed_dim=32, max_seq_length=32, seq=8, batch B = 2 * HW = 32.
    h, w, embed_dim, max_seq = 4, 4, 32, 32
    seq, repeat = 8, 2
    B = repeat * h * w

    key = jax.random.PRNGKey(0)
    k_embed, k_x = jax.random.split(key)

    module = MotionEmbeddingSpatial(h, w, embed_dim, max_seq, key=k_embed)
    module.set_scale(0.5)

    x = jax.random.normal(k_x, (B, seq, embed_dim), dtype=jnp.float32)

    out = jax.block_until_ready(module(x))

    # Pure-JAX reference check.
    ref = x + jnp.tile(module.embed[:, :seq], (repeat, 1, 1)) * module.scale
    assert out.shape == x.shape
    assert jnp.allclose(out, ref, atol=1e-6, rtol=1e-6)

    print("KERNEL_OK")
</pallas_src>

<mosaic_0001>
module attributes {stable_mosaic.version = 11 : i64} {
  func.func @_add_embed_kernel(%arg0: i32, %arg1: i32, %arg2: memref<2x2048xf32, #tpu.memory_space<vmem>>, %arg3: memref<1x2048xf32, #tpu.memory_space<vmem>>, %arg4: memref<2x2048xf32, #tpu.memory_space<vmem>>) attributes {dimension_semantics = [#tpu.dimension_semantics<parallel>, #tpu.dimension_semantics<parallel>], iteration_bounds = array<i64: 2, 1>, scalar_prefetch = 0 : i64, scratch_operands = 0 : i64, tpu.core_type = #tpu.core_type<tc>, window_params = [{transform_indices = @transform_0, window_bounds = array<i64: 2, 2048>}, {transform_indices = @transform_1, window_bounds = array<i64: 1, 2048>}, {transform_indices = @transform_2, window_bounds = array<i64: 2, 2048>}]} {
    %c0 = arith.constant 0 : index
    %c0_0 = arith.constant 0 : index
    %0 = vector.load %arg2[%c0, %c0_0] : memref<2x2048xf32, #tpu.memory_space<vmem>>, vector<2x2048xf32>
    %c0_1 = arith.constant 0 : index
    %c0_2 = arith.constant 0 : index
    %1 = vector.load %arg3[%c0_1, %c0_2] : memref<1x2048xf32, #tpu.memory_space<vmem>>, vector<1x2048xf32>
    %cst = arith.constant 5.000000e-01 : f32
    %2 = vector.broadcast %cst : f32 to vector<1x2048xf32>
    %3 = arith.mulf %1, %2 : vector<1x2048xf32>
    %4 = vector.broadcast %3 : vector<1x2048xf32> to vector<2x2048xf32>
    %5 = arith.addf %0, %4 : vector<2x2048xf32>
    %c0_3 = arith.constant 0 : index
    %c0_4 = arith.constant 0 : index
    %6 = vector.load %arg4[%c0_3, %c0_4] : memref<2x2048xf32, #tpu.memory_space<vmem>>, vector<2x2048xf32>
    tpu.vector_store %arg4[%c0_3, %c0_4], %5 {strides = array<i32>} : memref<2x2048xf32, #tpu.memory_space<vmem>>, vector<2x2048xf32>,
    return
  }
  func.func @transform_0(%arg0: i32, %arg1: i32) -> (i32, i32) {
    %c0_i32 = arith.constant 0 : i32
    return %arg1, %arg0 : i32, i32
  }
  func.func @transform_1(%arg0: i32, %arg1: i32) -> (i32, i32) {
    %c0_i32 = arith.constant 0 : i32
    %c0_i32_0 = arith.constant 0 : i32
    return %c0_i32, %arg0 : i32, i32
  }
  func.func @transform_2(%arg0: i32, %arg1: i32) -> (i32, i32) {
    %c0_i32 = arith.constant 0 : i32
    return %arg1, %arg0 : i32, i32
  }
}

</mosaic_0001>

<bundles_post_ra>
// kernel: tpu_custom_call.1
= control target key start
LH: loop header
LB: loop body
LE: loop exit
PB: predicated region body
PF: predicated region fallthrough
CT: control target
= control target key end

     0   :  { %7 = vsyncpa [#allocation3], 0  ;;  %s979_s0 = inlined_call_operand.hbm [shape: f32[2,4096], index: 0, kind: input, shape index: {}]   ;;  %s980_s1 = inlined_call_operand.hbm [shape: f32[1,4096], index: 1, kind: input, shape index: {}]   ;;  %s981_s2 = inlined_call_operand.hbm [shape: f32[2,4096], index: 2, kind: output, shape index: {}]  }
   0x1   :  { %9 = vsyncpa [#allocation3 + $0x1], 0 }
   0x2   :  { %10 = vsyncpa [#allocation6], 0 }
   0x3   :  { %12 = vsyncpa [#allocation6 + $0x1], 0 }
   0x4   :  { %13 = vsyncpa [#allocation4], 0 }
   0x5   :  { %15 = vsyncpa [#allocation4 + $0x1], 0  ;;  %s754_s9 = smov 0   ;;  %s756_s10 = smov 0  }
   0x6   :  { %s758_s11 = smov 0   ;;  %s760_s12 = smov 0  }
   0x7   :  { %s762_s13 = smov 0   ;;  %s764_s14 = smov 0  }
   0x8 LB: > { %s497_s15 = sadd.s32 4294967295, %s733_s14   ;;  %s498_s16 = sadd.s32 4294967294, %s733_s14   ;;  %s733_s14 = sphi %s764_s14, %s21_s14   ;;  %s729_s13 = sphi %s762_s13, %s1001_s13   ;;  %s725_s12 = sphi %s760_s12, %s1000_s12   ;;  %s721_s11 = sphi %s758_s11, %s999_s11   ;;  %s717_s10 = sphi %s756_s10, %s998_s10   ;;  %s713_s9 = sphi %s754_s9, %s997_s9  }
   0x9   : > { %s33_s17 = sadd.s32 1, %s729_s13  ;;  %s42_s18 = sadd.s32 1, %s721_s11 }
   0xa   : > { %p35_p0 = scmp.ge.s32.totalorder %s33_s17, 2  ;;  %p49_p1 = scmp.ne.s32.totalorder %s721_s11, %s717_s10 }
   0xb   : > { %p50_p2 = scmp.eq.s32.totalorder %s733_s14, 0  ;;  %p55_p3 = scmp.ne.s32.totalorder %s717_s10, %s713_s9 }
   0xc   : > { %s1003_s17 = smov (%p35_p0, %s33_s17), 0  ;;  %p56_p5 = scmp.eq.s32.totalorder %s497_s15, 0 }
   0xd   : > { %p795_p4 = por %p50_p2, %p49_p1  ;;  %s38_s20 = ssub.s32 %s729_s13, %s1003_s17 }
   0xe   : > { %p107_p6 = scmp.eq.s32.totalorder %s497_s15, 1  ;;  %p40_p7 = scmp.eq.s32.totalorder %s38_s20, 0 }
   0xf   : > { %p801_p8 = por %p56_p5, %p55_p3  ;;  %p113_p10 = scmp.eq.s32.totalorder %s498_s16, 1 }
  0x10   : > { %p805_p9 = por %p107_p6, %p49_p1  ;;  %p536_p13 = scmp.lt.s32.totalorder %s733_s14, 2 }
  0x11   : > { %s985_s21 = scalar_select %p801_p8, 1, 0 }
  0x12   : > { %s986_s22 = scalar_select %p805_p9, 1, 0 }
  0x13   : > { %s810_s23 = scalar_select %p40_p7, %s721_s11, %s42_s18  }
  0x14   : > { %p812_p11 = por %p113_p10, %p55_p3  ;;  %s819_s25 = sand.u32 1, %s721_s11  }
  0x15   : > { %s501_s26 = sshll.u32 %s819_s25, 5  ;;  %s516_s27 = sshll.u32 %s729_s13, 9 }
  0x16   : > { %s987_s24 = scalar_select %p812_p11, 1, 0 }
  0x17   : > { %s826_s30 = scalar_lea.hbm %s979_s0, %s516_s27  ;;  %s137_s3 = scalar_lea.vmem [#allocation2], %s501_s26 }
  0x18   : > { %s147_s4 = sshll.u32 %s137_s3, 4  ;;  %p832_p0 = pnand %p536_p13, %p795_p4  ;;  %s828_s4 = int_to_ptr.vmem [resolvable:$true] %s147_s4 }
  0x19   : > { %s134_s6 = scalar_lea.sflag [#allocation3], %s819_s25  ;;  %s587_s7 = scalar_lea.hbm %s826_s30, 512 }
  0x1a   : > { %p588_p3 = scmp.ne.s32.totalorder %s826_s30, %s587_s7  ;;  %p589_p5 = pneg %p832_p0 }
  0x1b   : > { %s592_s16 = scalar_lea.hbm %s979_s0, 1024  ;;  %p593_p4 = scmp.lt.u32.totalorder %s826_s30, %s979_s0 }
  0x1c   : > { %p590_p6 = pnand %p589_p5, %p588_p3  ;;  %p594_p10 = scmp.lt.u32.totalorder %s592_s16, %s587_s7 }
  0x1d   : > { %p596_p12 = scmp.lt.u32.totalorder %s587_s7, %s826_s30 }
  0x1e   : > { %p591_p7 = pneg %p590_p6  ;;  %p595_p13 = por %p594_p10, %p593_p4 }
  0x20   : > { %p597_p1 = por %p596_p12, %p595_p13 }
  0x22   : > { %p598_p2 = pnand %p597_p1, %p591_p7 }
  0x24   : > { %601 = shalt.err (!%p598_p2)
}
  0x25   : > { %s602_s20 = scalar_lea.vmem %s828_s4, 512  ;;  %s735_s26 = smov [#allocation2]  }
  0x26   : > { %p603_p3 = scmp.ne.s32.totalorder %s828_s4, %s602_s20  ;;  %s607_s27 = sshll.u32 %s735_s26, 4  ;;  %s608_s27 = int_to_ptr.vmem [resolvable:$false] %s607_s27 }
  0x27   : > { %s609_s28 = scalar_lea.vmem %s608_s27, 1024  ;;  %p610_p9 = scmp.lt.s32.totalorder %s828_s4, %s608_s27 }
  0x28   : > { %p605_p6 = pnand %p603_p3, %p589_p5  ;;  %p611_p4 = scmp.lt.s32.totalorder %s609_s28, %s602_s20 }
  0x2a   : > { %p606_p11 = pneg %p605_p6  ;;  %p612_p10 = por %p611_p4, %p610_p9 }
  0x2c   : > { %p613_p12 = pnand %p612_p10, %p606_p11 }
  0x2e   : > { %616 = shalt.err (!%p613_p12)
}
  0x2f   : > { %528 = dma.hbm_to_vmem [thread:$0]  (!%p832_p0), %s826_s30, 512, %s828_s4, %s134_s6  }
  0x30   : > { %p989_p1 = scmp.lt.s32.totalorder %s733_s14, 3  ;;  %p990_p2 = scmp.ge.s32.totalorder %s733_s14, 1 }
  0x31   : > { %s504_s3 = sshll.u32 %s819_s25, 4  ;;  %s517_s7 = sshll.u32 %s729_s13, 8 }
  0x32   : > { %p868_p7 = pnand %p990_p2, %p989_p1  ;;  %s877_s16 = scalar_lea.hbm %s980_s1, %s517_s7 }
  0x33   : > { %s158_s18 = scalar_lea.vmem [#allocation5], %s504_s3  ;;  %s155_s30 = scalar_lea.sflag [#allocation6], %s819_s25 }
  0x34   : > { %s991_s29 = scalar_select %p868_p7, 1, 0 }
  0x35   : > { %s166_s19 = sshll.u32 %s158_s18, 4  ;;  %s617_s4 = scalar_lea.hbm %s877_s16, 256  ;;  %s167_s19 = int_to_ptr.vmem [resolvable:$true] %s166_s19 }
  0x36   : > { %p618_p9 = scmp.ne.s32.totalorder %s877_s16, %s617_s4  ;;  %s622_s26 = scalar_lea.hbm %s980_s1, 512 }
  0x37   : > { %p623_p3 = scmp.lt.u32.totalorder %s877_s16, %s980_s1  ;;  %p624_p6 = scmp.lt.u32.totalorder %s622_s26, %s617_s4 }
  0x38   : > { %p620_p11 = pnand %p618_p9, %p589_p5  ;;  %p626_p10 = scmp.lt.u32.totalorder %s617_s4, %s877_s16 }
  0x39   : > { %p625_p4 = por %p624_p6, %p623_p3 }
  0x3a   : > { %p621_p13 = pneg %p620_p11 }
  0x3b   : > { %p627_p12 = por %p626_p10, %p625_p4 }
  0x3d   : > { %p628_p1 = pnand %p627_p12, %p621_p13 }
  0x3f   : > { %631 = shalt.err (!%p628_p1)
}
  0x40   : > { %s632_s25 = scalar_lea.vmem %s167_s19, 256  ;;  %s736_s3 = smov [#allocation5]  }
  0x41   : > { %p633_p2 = scmp.ne.s32.totalorder %s167_s19, %s632_s25  ;;  %s637_s7 = sshll.u32 %s736_s3, 4  ;;  %s638_s7 = int_to_ptr.vmem [resolvable:$false] %s637_s7 }
  0x42   : > { %s639_s8 = scalar_lea.vmem %s638_s7, 512  ;;  %p640_p8 = scmp.lt.s32.totalorder %s167_s19, %s638_s7 }
  0x43   : > { %p635_p9 = pnand %p633_p2, %p589_p5  ;;  %p641_p7 = scmp.lt.s32.totalorder %s639_s8, %s632_s25 }
  0x45   : > { %p636_p11 = pneg %p635_p9  ;;  %p642_p3 = por %p641_p7, %p640_p8 }
  0x47   : > { %p643_p6 = pnand %p642_p3, %p636_p11 }
  0x49   : > { %646 = shalt.err (!%p643_p6)
}
  0x4a   : > { %531 = dma.hbm_to_vmem [thread:$0]  (!%p832_p0), %s877_s16, 256, %s167_s19, %s155_s30  }
  0x4b   : > { %p992_p13 = scmp.ne.s32.totalorder %s991_s29, 0 }
  0x4c   : > { %s902_s15 = sand.u32 (!%p992_p13), 1, %s717_s10   ;;  %p993_p8 = scmp.ne.s32.totalorder (!%p992_p13), %s985_s21, 0 }
  0x4d   : > { %175 = sbr.rel (%p992_p13) target bundleno = 124 (0x7c), region = 28  ;;  %s508_s18 = sshll.u32 (!%p992_p13), %s902_s15, 5 }
  0x4e   : > { %s178_s4 = scalar_lea.sflag (!%p992_p13), [#allocation3], %s902_s15  ;;  %s908_s6 = scalar_lea.vmem (!%p992_p13), [#allocation2], %s508_s18 }
  0x54   : > { %700 = dma.done.wait (%p993_p8), %s178_s4, 512  }
  0x55   : > { %702 = vsyncadd (%p993_p8), %s178_s4, 4294966784  ;;  %s509_s5 = sshll.u32 %s902_s15, 4  ;;  %s187_s29 = scalar_lea.sflag [#allocation6], %s902_s15 }
  0x56   : > { %s190_s16 = scalar_lea.vmem [#allocation5], %s509_s5 }
  0x57   : > { %704 = dma.done.wait (%p993_p8), %s187_s29, 256  }
  0x58   : > { %706 = vsyncadd (%p993_p8), %s187_s29, 4294967040  ;;  %v229_v0 = vlaneseq  ;;  %v737_v1 = vmov 1983009808   ;;  %v223_v9 = vld [vmem:[%s190_s16] sm:$0xff]  ;;  %v224_v15 = vld [vmem:[%s190_s16 + $0x8] sm:$0xff]  ;;  %s215_s21 = scalar_lea.vmem [#allocation7], %s508_s18 }
  0x59   : > { %v296_v2 = vunpack.c.l.s4 %v737_v1  ;;  %v225_v14 = vmul.f32 0.5, %v223_v9  ;;  %v226_v17 = vmul.f32 0.5, %v224_v15  ;;  %v219_v38 = vld [vmem:[%s908_s6] sm:$0xff]  ;;  %v220_v44 = vld [vmem:[%s908_s6 + $0x8] sm:$0xff]  ;;  %v221_v52 = vld [vmem:[%s908_s6 + $0x10] sm:$0xff]  ;;  %s390_s19 = sshll.u32 %s215_s21, 4  ;;  %s927_s19 = int_to_ptr.vmem [resolvable:$true] %s390_s19 }
  0x5a   : > { %v230_v3 = vshrl.u32 %v229_v0, 7  ;;  %v222_v59 = vld [vmem:[%s908_s6 + $0x18] sm:$0xff]  ;;  %s518_s30 = sshll.u32 %s725_s12, 9  ;;  %s374_s28 = scalar_lea.sflag [#allocation4], %s902_s15 }
  0x5b   : > { %v297_v4 = vunpack.c.0.s8 %v296_v2  ;;  %s932_s27 = scalar_lea.hbm %s981_s2, %s518_s30  ;;  %s647_s25 = scalar_lea.vmem %s927_s19, 512 }
  0x5c   : > { %v231_v5 = vsub.s32 0, %v230_v3  ;;  %v235_v6 = vsub.s32 1, %v230_v3  ;;  %v239_v7 = vsub.s32 2, %v230_v3  ;;  %v243_v8 = vsub.s32 3, %v230_v3  ;;  %p648_p0 = scmp.ne.s32.totalorder %s927_s19, %s647_s25  ;;  %p994_p5 = scmp.ne.s32.totalorder %s986_s22, 0 }
  0x5d   : > { %v247_v10 = vsub.s32 4, %v230_v3  ;;  %v251_v11 = vsub.s32 5, %v230_v3  ;;  %v255_v12 = vsub.s32 6, %v230_v3  ;;  %v259_v13 = vsub.s32 7, %v230_v3  ;;  %s738_s12 = smov [#allocation7]  }
  0x5e   : > { %v300_v16 = vsub.s32 %v297_v4, %v230_v3  ;;  %v232_v18 = vrot.slane %v225_v14, %v231_v5  ;;  %v236_v19 = vrot.slane %v225_v14, %v235_v6  ;;  %v240_v20 = vrot.slane %v225_v14, %v239_v7  ;;  %p649_p7 = pnand %p648_p0, %p994_p5  ;;  %s651_s3 = sshll.u32 %s738_s12, 4  ;;  %s652_s3 = int_to_ptr.vmem [resolvable:$false] %s651_s3 }
  0x5f   : > { %v244_v21 = vrot.slane %v225_v14, %v243_v8  ;;  %v248_v22 = vrot.slane %v225_v14, %v247_v10  ;;  %v252_v23 = vrot.slane %v225_v14, %v251_v11  ;;  %v256_v24 = vrot.slane %v225_v14, %v255_v12  ;;  %s653_s7 = scalar_lea.vmem %s652_s3, 1024  ;;  %p654_p10 = scmp.lt.s32.totalorder %s927_s19, %s652_s3 }
  0x60   : > { %v260_v25 = vrot.slane %v225_v14, %v259_v13  ;;  %v293_v26 = vcombine.low %v232_v18, %v236_v19  ;;  %v264_v28 = vrot.slane %v226_v17, %v231_v5  ;;  %v268_v29 = vrot.slane %v226_v17, %v235_v6  ;;  %p650_p4 = pneg %p649_p7  ;;  %p655_p12 = scmp.lt.s32.totalorder %s653_s7, %s647_s25 }
  0x61   : > { %v294_v27 = vcombine.low %v240_v20, %v244_v21  ;;  %v310_v30 = vcombine.low %v248_v22, %v252_v23  ;;  %v272_v32 = vrot.slane %v226_v17, %v239_v7  ;;  %v276_v33 = vrot.slane %v226_v17, %v243_v8 }
  0x62   : > { %v311_v31 = vcombine.low %v256_v24, %v260_v25  ;;  %v301_v34 = vrot.slane %v293_v26, %v300_v16  ;;  %v327_v36 = vcombine.low %v264_v28, %v268_v29  ;;  %v280_v37 = vrot.slane %v226_v17, %v247_v10  ;;  %p656_p1 = por %p655_p12, %p654_p10 }
  0x63   : > { %v308_v35 = vrot.slane %v294_v27, %v300_v16  ;;  %v318_v39 = vrot.slane %v310_v30, %v300_v16  ;;  %v328_v41 = vcombine.low %v272_v32, %v276_v33  ;;  %v284_v42 = vrot.slane %v226_v17, %v251_v11 }
  0x64   : > { %v325_v40 = vrot.slane %v311_v31, %v300_v16  ;;  %v335_v45 = vrot.slane %v327_v36, %v300_v16  ;;  %v288_v46 = vrot.slane %v226_v17, %v255_v12  ;;  %v292_v47 = vrot.slane %v226_v17, %v259_v13  ;;  %p657_p2 = pnand %p656_p1, %p650_p4 }
  0x65   : > { %v309_v43 = vcombine.low %v301_v34, %v308_v35  ;;  %v342_v49 = vrot.slane %v328_v41, %v300_v16  ;;  %v344_v50 = vcombine.low %v280_v37, %v284_v42 }
  0x66   : > { %v326_v48 = vcombine.low %v318_v39, %v325_v40  ;;  %v345_v53 = vcombine.low %v288_v46, %v292_v47 }
  0x67   : > { %v365_v51 = vadd.f32 %v309_v43, %v219_v38  ;;  %v343_v55 = vcombine.low %v335_v45, %v342_v49  ;;  %v352_v56 = vrot.slane %v344_v50, %v300_v16 }
  0x68   : > { %v366_v54 = vadd.f32 %v326_v48, %v220_v44  ;;  %v359_v57 = vrot.slane %v345_v53, %v300_v16 }
  0x69   : > { %369 = vst [vmem:[%s215_s21] sm:$0xff] %v365_v51  ;;  %v367_v58 = vadd.f32 %v343_v55, %v221_v52 }
  0x6a   : > { %370 = vst [vmem:[%s215_s21 + $0x8] sm:$0xff] %v366_v54  ;;  %v360_v60 = vcombine.low %v352_v56, %v359_v57 }
  0x6b   : > { %371 = vst [vmem:[%s215_s21 + $0x10] sm:$0xff] %v367_v58 }
  0x6c   : > { %v368_v61 = vadd.f32 %v360_v60, %v222_v59 }
  0x6e   : > { %372 = vst [vmem:[%s215_s21 + $0x18] sm:$0xff] %v368_v61 }
  0x6f   : > { %660 = shalt.err (!%p657_p2)
}
  0x70   : > { %s661_s8 = scalar_lea.hbm %s932_s27, 512  ;;  %s665_s4 = scalar_lea.hbm %s981_s2, 1024 }
  0x71   : > { %p662_p9 = scmp.ne.s32.totalorder %s932_s27, %s661_s8  ;;  %p666_p6 = scmp.lt.u32.totalorder %s932_s27, %s981_s2 }
  0x72   : > { %p667_p13 = scmp.lt.u32.totalorder %s665_s4, %s661_s8  ;;  %p669_p0 = scmp.lt.u32.totalorder %s661_s8, %s932_s27 }
  0x73   : > { %p663_p11 = pnand %p662_p9, %p994_p5 }
  0x74   : > { %p668_p8 = por %p667_p13, %p666_p6 }
  0x75   : > { %p664_p3 = pneg %p663_p11 }
  0x76   : > { %p670_p7 = por %p669_p0, %p668_p8 }
  0x78   : > { %p671_p4 = pnand %p670_p7, %p664_p3 }
  0x7a   : > { %674 = shalt.err (!%p671_p4)
}
  0x7b   : > { %523 = dma.vmem_to_hbm [thread:$0]  (%p994_p5), %s927_s19, 512, %s932_s27, %s374_s28  }
  0x7c PF: > { %s402_s29 = sand.u32 1, %s713_s9   ;;  %p995_p10 = scmp.ne.s32.totalorder %s987_s24, 0 }
  0x7d   : > { %p996_p12 = scmp.ge.s32.totalorder %s733_s14, 2  ;;  %s403_s16 = scalar_lea.sflag [#allocation4], %s402_s29 }
  0x7f   : > { %p533_p1 = pnand %p996_p12, %p995_p10 }
  0x81   : > { %708 = dma.done.wait (!%p533_p1), %s403_s16, 512  }
  0x82   : > { %710 = vsyncadd (!%p533_p1), %s403_s16, 4294966784  ;;  %s21_s14 = sadd.s32 1, %s733_s14   ;;  %s997_s9 = smov %s717_s10 }
  0x83   : > { %p18_p2 = scmp.ge.s32.totalorder %s21_s14, 4   ;;  %s998_s10 = smov %s721_s11 }
  0x84   : > { %s999_s11 = smov %s810_s23  ;;  %s1000_s12 = smov %s729_s13 }
  0x85   : > { %s1001_s13 = smov %s1003_s17  ;;  %20 = sbr.rel (!%p18_p2) target bundleno = 8 (0x8), region = 86 }
  0x8c   :  { %408 = vsyncpa [#allocation3], 1 }
  0x8d   :  { %410 = vsyncpa [#allocation3 + $0x1], 1 }
  0x8e   :  { %411 = vsyncpa [#allocation6], 1 }
  0x8f   :  { %413 = vsyncpa [#allocation6 + $0x1], 1 }
  0x90   :  { %414 = vsyncpa [#allocation4], 1 }
  0x91   :  { %416 = vsyncpa [#allocation4 + $0x1], 1 }

</bundles_post_ra>
